<compile_context>
chip_gen: v6e
topology: v6e:2x2x1
jax: 0.10.0
libtpu: 0.0.40
codegen_flags: <defaults>
</compile_context>

<pallas_src>
import functools

import jax
import jax.numpy as jnp
from jax.experimental import pallas as pl
from jax.experimental.pallas import tpu as pltpu

_MiB = 1024 * 1024


def _round_up(v, m):
    return ((v + m - 1) // m) * m


def _sublane_multiple(itemsize):
    # (8,128) f32 vreg tiles; sub-32-bit dtypes pack along the sublane axis.
    return {4: 8, 2: 16, 1: 32}.get(int(itemsize), 8)


@functools.lru_cache(maxsize=1)
def _vmem_capacity_bytes():
    try:
        cap = getattr(pltpu.get_tpu_info(), "vmem_capacity_bytes", None)
        if cap:
            return int(cap)
    except Exception:
        pass
    return 64 * _MiB  # conservative fallback (v7x per-core VMEM)


def _vmem_limits():
    cap = _vmem_capacity_bytes()
    vmem_limit = min((cap * 3) // 4, 100 * _MiB)      # 96 MiB v5e/v6e, 48 MiB v7x
    single_budget = max(16 * _MiB, vmem_limit - 8 * _MiB)
    likely_multi_tc = cap < 96 * _MiB                 # v7x-like: 2 TCs per chip
    return vmem_limit, single_budget, likely_multi_tc


# ---------------------------------------------------------------------------
# Single-pass path: pool + MLP + gate on one whole [C, HW] plane per batch.
# 2 HBM passes over x (1 read, 1 write).  Full-extent blocks => no padding.
# ---------------------------------------------------------------------------
def _make_single_pass_kernel(hw):
    inv_hw = 1.0 / float(hw)

    def kernel(x_ref, w1_ref, b1_ref, w2_ref, b2_ref, o_ref):
        # x_ref : [C, HW] native dtype; w1/w2: [C, C] f32; b1/b2: [C, 1] f32.
        x = x_ref[...]
        # AdaptiveAvgPool2d(1): lane-axis reduction with f32 accumulation.
        pooled = jnp.sum(x.astype(jnp.float32), axis=-1, keepdims=True) * inv_hw
        # conv1 (1x1) == W1 @ pooled, then ReLU.
        h = jnp.dot(w1_ref[...], pooled, preferred_element_type=jnp.float32) + b1_ref[...]
        h = jnp.maximum(h, 0.0)
        # conv2 (1x1) == W2 @ h, then Sigmoid.
        s = jnp.dot(w2_ref[...], h, preferred_element_type=jnp.float32) + b2_ref[...]
        s = jax.nn.sigmoid(s)                                   # [C, 1]
        # Per-channel gating in the input's native dtype (no f32 plane copy).
        o_ref[...] = x * s.astype(x.dtype)

    return kernel


def _cab_single_pass(x, w1, b1, w2, b2, vmem_limit):
    # x: [B, C, HW]
    B, C, HW = x.shape
    itemsize = jnp.dtype(x.dtype).itemsize

    w1k = w1.reshape(C, C).astype(jnp.float32)
    w2k = w2.reshape(C, C).astype(jnp.float32)
    b1k = b1.reshape(C, 1).astype(jnp.float32)
    b2k = b2.reshape(C, 1).astype(jnp.float32)

    cost = pl.CostEstimate(
        flops=int(B * (2 * C * HW + 4 * C * C)),
        transcendentals=int(B * C),
        bytes_accessed=int(2 * B * C * HW * itemsize))

    return pl.pallas_call(
        _make_single_pass_kernel(HW),
        out_shape=jax.ShapeDtypeStruct((B, C, HW), x.dtype),
        grid_spec=pltpu.PrefetchScalarGridSpec(
            num_scalar_prefetch=0,
            grid=(B,),
            in_specs=[
                pl.BlockSpec((None, C, HW), lambda b: (b, 0, 0)),
                pl.BlockSpec((C, C), lambda b: (0, 0)),
                pl.BlockSpec((C, 1), lambda b: (0, 0)),
                pl.BlockSpec((C, C), lambda b: (0, 0)),
                pl.BlockSpec((C, 1), lambda b: (0, 0)),
            ],
            out_specs=pl.BlockSpec((None, C, HW), lambda b: (b, 0, 0)),
        ),
        compiler_params=pltpu.CompilerParams(
            dimension_semantics=("parallel",),
            vmem_limit_bytes=int(vmem_limit)),
        cost_estimate=cost,
    )(x, w1k, b1k, w2k, b2k)


# ---------------------------------------------------------------------------
# Two-pass path: HW-tiled pooling kernel -> tiny jnp MLP -> HW-tiled gating.
# x is viewed as [B*C, HW] (channels packed onto sublanes; good for small C).
# 3 HBM passes over x.  No padding: the tail tile is masked in-kernel.
# ---------------------------------------------------------------------------
def _make_pool_kernel(thw, true_hw, tiles_per_split, needs_mask):
    def kernel(x_ref, sum_ref):
        # x_ref: [tr, thw] native dtype; sum_ref: [tr, 1] f32 (resident over t).
        t = pl.program_id(2)

        @pl.when(t == 0)
        def _():
            sum_ref[...] = jnp.zeros_like(sum_ref)

        x = x_ref[...].astype(jnp.float32)
        if needs_mask:
            # Partial last HW tile: OOB block reads are garbage-padded, so
            # zero the lanes past the true extent before the reduction.
            off = (pl.program_id(0) * tiles_per_split + t) * thw
            lane = jax.lax.broadcasted_iota(jnp.int32, x.shape, 1)
            x = jnp.where(off + lane < true_hw, x, 0.0)
        sum_ref[...] += jnp.sum(x, axis=-1, keepdims=True)

    return kernel


def _gate_kernel(s_ref, x_ref, o_ref):
    # s_ref: [tr, 1] f32; x_ref/o_ref: [tr, thw].  Multiply in f32 and cast on
    # store so low-precision inputs match the f32 reference; tail stores are
    # masked by Pallas automatically.
    o_ref[...] = (x_ref[...].astype(jnp.float32) * s_ref[...]).astype(o_ref.dtype)


def _cab_two_pass(x, w1, b1, w2, b2, B, C, vmem_limit, hw_tile=None):
    # x: [B*C, HW]
    R, HW = x.shape
    itemsize = jnp.dtype(x.dtype).itemsize
    sub = _sublane_multiple(itemsize)

    # Row tile: full R when small (full-extent dims are layout-exempt), else
    # sublane-aligned blocks (last row block may be partial; stores are masked).
    if R <= sub:
        tr = R
    else:
        tr = max(sub, min(256, (R // sub) * sub))
    n_rows = pl.cdiv(R, tr)

    # Lane tile: largest 128-multiple keeping in+out double-buffered blocks plus
    # the f32 working copy within the tile budget.
    tile_budget = min(8 * _MiB, vmem_limit // 4)
    if hw_tile is not None:
        thw = int(hw_tile)
        assert thw % 128 == 0, "hw_tile must be a multiple of 128"
    else:
        per_lane = tr * (4 * itemsize + 4)
        thw = max(128, (tile_budget // per_lane) // 128 * 128)
    thw = int(min(thw, _round_up(HW, 128)))
    n_hw = pl.cdiv(HW, thw)
    needs_mask = (HW % thw) != 0

    # Core-split the pooling reduction when row parallelism alone cannot feed
    # two TensorCores (leading "parallel" axis of size 2; partials combined in
    # the hoisted MLP).  Harmless on single-core chips.
    split = 2 if (n_rows == 1 and n_hw >= 2 and n_hw % 2 == 0) else 1
    tiles_per_split = n_hw // split

    # ---- Pass 1: per-row spatial sums (1 HBM read of x). ----
    pool_cost = pl.CostEstimate(
        flops=int(R * HW), transcendentals=0,
        bytes_accessed=int(R * HW * itemsize + split * R * 4))

    partial_sums = pl.pallas_call(
        _make_pool_kernel(thw, HW, tiles_per_split, needs_mask),
        out_shape=jax.ShapeDtypeStruct((split, R, 1), jnp.float32),
        grid_spec=pltpu.PrefetchScalarGridSpec(
            num_scalar_prefetch=0,
            grid=(split, n_rows, tiles_per_split),
            in_specs=[pl.BlockSpec(
                (tr, thw), lambda s, r, t: (r, s * tiles_per_split + t))],
            out_specs=pl.BlockSpec((None, tr, 1), lambda s, r, t: (s, r, 0)),
        ),
        compiler_params=pltpu.CompilerParams(
            dimension_semantics=("parallel", "parallel", "arbitrary"),
            vmem_limit_bytes=int(vmem_limit)),
        cost_estimate=pool_cost,
    )(x)

    # ---- Squeeze/excite MLP hoisted to plain jnp (tiny [B,C]@[C,C] matmuls). ----
    sums = partial_sums.sum(axis=0)                       # [R, 1] f32
    pooled = sums.reshape(B, C) * (1.0 / float(HW))       # [B, C] f32
    w1m = w1.reshape(C, C).astype(jnp.float32)
    w2m = w2.reshape(C, C).astype(jnp.float32)
    h = jnp.maximum(pooled @ w1m.T + b1.astype(jnp.float32), 0.0)
    s = jax.nn.sigmoid(h @ w2m.T + b2.astype(jnp.float32))
    s_col = s.reshape(R, 1)                                # f32 per-row scale

    # ---- Pass 2: per-row gating, tiled over HW; both grid axes parallel. ----
    gate_cost = pl.CostEstimate(
        flops=int(R * HW), transcendentals=0,
        bytes_accessed=int(2 * R * HW * itemsize + R * 4))

    out = pl.pallas_call(
        _gate_kernel,
        out_shape=jax.ShapeDtypeStruct((R, HW), x.dtype),
        grid_spec=pltpu.PrefetchScalarGridSpec(
            num_scalar_prefetch=0,
            grid=(n_rows, n_hw),
            in_specs=[
                pl.BlockSpec((tr, 1), lambda r, t: (r, 0)),
                pl.BlockSpec((tr, thw), lambda r, t: (r, t)),
            ],
            out_specs=pl.BlockSpec((tr, thw), lambda r, t: (r, t)),
        ),
        compiler_params=pltpu.CompilerParams(
            dimension_semantics=("parallel", "parallel"),
            vmem_limit_bytes=int(vmem_limit)),
        cost_estimate=gate_cost,
    )(s_col, x)
    return out


# ---------------------------------------------------------------------------
# Public wrapper (NCHW in / NCHW out; reshapes only, never a transpose or pad).
# ---------------------------------------------------------------------------
def cab_forward(x_nchw, w1, b1, w2, b2, *, force_two_pass=False, hw_tile=None):
    """x_nchw: [B, C, H, W]; w1/w2: torch conv weights [C, C, 1, 1]; b1/b2: [C]."""
    B, C_in, H, W = x_nchw.shape
    C_out = w1.shape[0]
    # The reference `s * input_tensor` only broadcasts when C_out == C_in.
    assert C_out == C_in, "CAB gating requires in_channels == out_channels"
    # TODO(synk): support a channel-reduction ratio (C -> C/r -> C) with
    # rectangular (C, C/r)/(C/r, C) weight BlockSpecs if the real module uses one.
    C = C_in
    HW = H * W
    itemsize = jnp.dtype(x_nchw.dtype).itemsize

    vmem_limit, single_budget, multi_tc = _vmem_limits()

    # Single-pass = 2 HBM passes over x (vs 3 for two-pass), but needs the whole
    # (double-buffered, sublane-padded) plane in VMEM and only B-way parallelism.
    sub = _sublane_multiple(itemsize)
    plane = _round_up(C, sub) * _round_up(HW, 128)
    single_bytes = 4 * plane * itemsize                 # in + out, double-buffered
    if itemsize < 4:
        # f32 temp from the pooling reduce on sub-32-bit inputs.
        single_bytes += _round_up(C, 8) * _round_up(HW, 128) * 4
    single_bytes += 4 * C * C * 4 + 1 * _MiB            # weights + headroom

    use_single = (not force_two_pass) and single_bytes <= single_budget
    if multi_tc and B == 1:
        # On 2-TC chips a grid of (B=1,) pins the whole plane to one core; the
        # two-pass HW-parallel grids stream x with both cores.
        use_single = False

    if use_single:
        out = _cab_single_pass(x_nchw.reshape(B, C, HW), w1, b1, w2, b2, vmem_limit)
    else:
        out = _cab_two_pass(x_nchw.reshape(B * C, HW), w1, b1, w2, b2,
                            B, C, vmem_limit, hw_tile)
    return out.reshape(B, C, H, W)


def cab_reference(x_nchw, w1, b1, w2, b2):
    """Pure-JAX reference matching the PyTorch module semantics (NCHW)."""
    B, C, H, W = x_nchw.shape
    pooled = jnp.mean(x_nchw, axis=(2, 3))                       # [B, C]
    h = pooled @ w1.reshape(C, C).T + b1                         # conv1 1x1
    h = jnp.maximum(h, 0.0)
    s = h @ w2.reshape(C, C).T + b2                              # conv2 1x1
    s = jax.nn.sigmoid(s)                                        # [B, C]
    return x_nchw * s[:, :, None, None]


if __name__ == "__main__":
    key = jax.random.PRNGKey(0)
    kx, kw1, kb1, kw2, kb2, kx2 = jax.random.split(key, 6)

    B, C, H, W = 2, 4, 16, 16
    x = jax.random.normal(kx, (B, C, H, W), dtype=jnp.float32)
    w1 = jax.random.normal(kw1, (C, C, 1, 1), dtype=jnp.float32) * 0.5
    b1 = jax.random.normal(kb1, (C,), dtype=jnp.float32) * 0.1
    w2 = jax.random.normal(kw2, (C, C, 1, 1), dtype=jnp.float32) * 0.5
    b2 = jax.random.normal(kb2, (C,), dtype=jnp.float32) * 0.1

    ref = jax.block_until_ready(cab_reference(x, w1, b1, w2, b2))

    # 1) Auto-selected path (single-pass on 128-MiB-VMEM chips at this size).
    out_auto = jax.block_until_ready(cab_forward(x, w1, b1, w2, b2))
    assert out_auto.shape == (B, C, H, W)
    assert jnp.allclose(out_auto, ref, atol=1e-5, rtol=1e-5), "auto path mismatch"

    # 2) Forced two-pass with explicit HW tiling (exercises flattened [B*C, HW]
    #    pool + core-split reduction + gate kernels).
    out_tp = jax.block_until_ready(
        cab_forward(x, w1, b1, w2, b2, force_two_pass=True, hw_tile=128))
    assert jnp.allclose(out_tp, ref, atol=1e-5, rtol=1e-5), "two-pass mismatch"

    # 3) Non-128-aligned H*W and B == 1: no padding anywhere; exercises the
    #    full-extent single-pass blocks and the masked-tail two-pass tiles.
    x2 = jax.random.normal(kx2, (1, C, 15, 15), dtype=jnp.float32)
    ref2 = jax.block_until_ready(cab_reference(x2, w1, b1, w2, b2))

    out2_auto = jax.block_until_ready(cab_forward(x2, w1, b1, w2, b2))
    assert jnp.allclose(out2_auto, ref2, atol=1e-5, rtol=1e-5), "unaligned auto mismatch"

    out2_tp = jax.block_until_ready(
        cab_forward(x2, w1, b1, w2, b2, force_two_pass=True, hw_tile=128))
    assert jnp.allclose(out2_tp, ref2, atol=1e-5, rtol=1e-5), "unaligned two-pass mismatch"

    print("KERNEL_OK")
</pallas_src>

<mosaic_0001>
module attributes {stable_mosaic.version = 11 : i64} {
  func.func @kernel(%arg0: i32, %arg1: memref<1x4x256xf32, #tpu.memory_space<vmem>>, %arg2: memref<4x4xf32, #tpu.memory_space<vmem>>, %arg3: memref<4x1xf32, #tpu.memory_space<vmem>>, %arg4: memref<4x4xf32, #tpu.memory_space<vmem>>, %arg5: memref<4x1xf32, #tpu.memory_space<vmem>>, %arg6: memref<1x4x256xf32, #tpu.memory_space<vmem>>) attributes {dimension_semantics = [#tpu.dimension_semantics<parallel>], iteration_bounds = array<i64: 2>, scalar_prefetch = 0 : i64, scratch_operands = 0 : i64, tpu.core_type = #tpu.core_type<tc>, window_params = [{transform_indices = @transform_0, window_bounds = array<i64: 1, 4, 256>}, {pipeline_mode = #tpu.pipeline_mode<synchronous>, transform_indices = @transform_1, window_bounds = array<i64: 4, 4>}, {pipeline_mode = #tpu.pipeline_mode<synchronous>, transform_indices = @transform_2, window_bounds = array<i64: 4, 1>}, {pipeline_mode = #tpu.pipeline_mode<synchronous>, transform_indices = @transform_3, window_bounds = array<i64: 4, 4>}, {pipeline_mode = #tpu.pipeline_mode<synchronous>, transform_indices = @transform_4, window_bounds = array<i64: 4, 1>}, {transform_indices = @transform_5, window_bounds = array<i64: 1, 4, 256>}]} {
    %c0 = arith.constant 0 : index
    %c0_0 = arith.constant 0 : index
    %c0_1 = arith.constant 0 : index
    %0 = vector.load %arg1[%c0, %c0_0, %c0_1] : memref<1x4x256xf32, #tpu.memory_space<vmem>>, vector<1x4x256xf32>
    %1 = vector.shape_cast %0 : vector<1x4x256xf32> to vector<4x256xf32>
    %cst = arith.constant dense<0.000000e+00> : vector<4xf32>
    %2 = vector.multi_reduction <add>, %1, %cst [1] : vector<4x256xf32> to vector<4xf32>
    %3 = vector.shape_cast %2 : vector<4xf32> to vector<4x1xf32>
    %cst_2 = arith.constant 3.906250e-03 : f32
    %4 = vector.broadcast %cst_2 : f32 to vector<4x1xf32>
    %5 = arith.mulf %3, %4 : vector<4x1xf32>
    %c0_3 = arith.constant 0 : index
    %c0_4 = arith.constant 0 : index
    %6 = vector.load %arg2[%c0_3, %c0_4] : memref<4x4xf32, #tpu.memory_space<vmem>>, vector<4x4xf32>
    %cst_5 = arith.constant dense<0.000000e+00> : vector<4x1xf32>
    %7 = tpu.matmul %6, %5, %cst_5 {dimension_numbers = #tpu.dot_dimension_numbers<[1], [0], [0], [1], [0, 0, 1, 1], [], []>} : vector<4x4xf32>, vector<4x1xf32>, vector<4x1xf32> -> vector<4x1xf32>
    %c0_6 = arith.constant 0 : index
    %c0_7 = arith.constant 0 : index
    %8 = vector.load %arg3[%c0_6, %c0_7] : memref<4x1xf32, #tpu.memory_space<vmem>>, vector<4x1xf32>
    %9 = arith.addf %7, %8 : vector<4x1xf32>
    %cst_8 = arith.constant 0.000000e+00 : f32
    %10 = vector.broadcast %cst_8 : f32 to vector<4x1xf32>
    %11 = arith.maximumf %9, %10 : vector<4x1xf32>
    %c0_9 = arith.constant 0 : index
    %c0_10 = arith.constant 0 : index
    %12 = vector.load %arg4[%c0_9, %c0_10] : memref<4x4xf32, #tpu.memory_space<vmem>>, vector<4x4xf32>
    %cst_11 = arith.constant dense<0.000000e+00> : vector<4x1xf32>
    %13 = tpu.matmul %12, %11, %cst_11 {dimension_numbers = #tpu.dot_dimension_numbers<[1], [0], [0], [1], [0, 0, 1, 1], [], []>} : vector<4x4xf32>, vector<4x1xf32>, vector<4x1xf32> -> vector<4x1xf32>
    %c0_12 = arith.constant 0 : index
    %c0_13 = arith.constant 0 : index
    %14 = vector.load %arg5[%c0_12, %c0_13] : memref<4x1xf32, #tpu.memory_space<vmem>>, vector<4x1xf32>
    %15 = arith.addf %13, %14 : vector<4x1xf32>
    %16 = arith.negf %15 : vector<4x1xf32>
    %17 = math.exp %16 : vector<4x1xf32>
    %cst_14 = arith.constant 1.000000e+00 : f32
    %18 = vector.broadcast %cst_14 : f32 to vector<4x1xf32>
    %19 = arith.addf %18, %17 : vector<4x1xf32>
    %20 = arith.divf %18, %19 : vector<4x1xf32>
    %21 = vector.broadcast %20 : vector<4x1xf32> to vector<4x256xf32>
    %22 = arith.mulf %1, %21 : vector<4x256xf32>
    %c0_15 = arith.constant 0 : index
    %c0_16 = arith.constant 0 : index
    %c0_17 = arith.constant 0 : index
    %23 = vector.load %arg6[%c0_15, %c0_16, %c0_17] : memref<1x4x256xf32, #tpu.memory_space<vmem>>, vector<1x4x256xf32>
    %24 = vector.shape_cast %23 : vector<1x4x256xf32> to vector<4x256xf32>
    %25 = vector.shape_cast %22 : vector<4x256xf32> to vector<1x4x256xf32>
    tpu.vector_store %arg6[%c0_15, %c0_16, %c0_17], %25 {strides = array<i32>} : memref<1x4x256xf32, #tpu.memory_space<vmem>>, vector<1x4x256xf32>,
    return
  }
  func.func @transform_0(%arg0: i32) -> (i32, i32, i32) {
    %c0_i32 = arith.constant 0 : i32
    %c0_i32_0 = arith.constant 0 : i32
    %c0_i32_1 = arith.constant 0 : i32
    return %arg0, %c0_i32, %c0_i32_0 : i32, i32, i32
  }
  func.func @transform_1(%arg0: i32) -> (i32, i32) {
    %c0_i32 = arith.constant 0 : i32
    %c0_i32_0 = arith.constant 0 : i32
    %c0_i32_1 = arith.constant 0 : i32
    return %c0_i32, %c0_i32_0 : i32, i32
  }
  func.func @transform_2(%arg0: i32) -> (i32, i32) {
    %c0_i32 = arith.constant 0 : i32
    %c0_i32_0 = arith.constant 0 : i32
    %c0_i32_1 = arith.constant 0 : i32
    return %c0_i32, %c0_i32_0 : i32, i32
  }
  func.func @transform_3(%arg0: i32) -> (i32, i32) {
    %c0_i32 = arith.constant 0 : i32
    %c0_i32_0 = arith.constant 0 : i32
    %c0_i32_1 = arith.constant 0 : i32
    return %c0_i32, %c0_i32_0 : i32, i32
  }
  func.func @transform_4(%arg0: i32) -> (i32, i32) {
    %c0_i32 = arith.constant 0 : i32
    %c0_i32_0 = arith.constant 0 : i32
    %c0_i32_1 = arith.constant 0 : i32
    return %c0_i32, %c0_i32_0 : i32, i32
  }
  func.func @transform_5(%arg0: i32) -> (i32, i32, i32) {
    %c0_i32 = arith.constant 0 : i32
    %c0_i32_0 = arith.constant 0 : i32
    %c0_i32_1 = arith.constant 0 : i32
    return %arg0, %c0_i32, %c0_i32_0 : i32, i32, i32
  }
}

</mosaic_0001>

<bundles_post_ra>
// kernel: tpu_custom_call.1
= control target key start
LH: loop header
LB: loop body
LE: loop exit
PB: predicated region body
PF: predicated region fallthrough
CT: control target
= control target key end

     0   :  { %10 = vsyncpa [#allocation3], 0  ;;  %s897_s0 = inlined_call_operand.hbm [shape: f32[2,4,256], index: 0, kind: input, shape index: {}]   ;;  %s898_s1 = inlined_call_operand.vmem [shape: f32[4,4], index: 1, kind: input, shape index: {}]   ;;  %s899_s2 = inlined_call_operand.vmem [shape: f32[4,1], index: 2, kind: input, shape index: {}]   ;;  %s900_s3 = inlined_call_operand.vmem [shape: f32[4,4], index: 3, kind: input, shape index: {}]   ;;  %s901_s4 = inlined_call_operand.vmem [shape: f32[4,1], index: 4, kind: input, shape index: {}]   ;;  %s902_s5 = inlined_call_operand.hbm [shape: f32[2,4,256], index: 5, kind: output, shape index: {}]  }
   0x1   :  { %12 = vsyncpa [#allocation3 + $0x1], 0 }
   0x2   :  { %13 = vsyncpa [#allocation4], 0 }
   0x3   :  { %15 = vsyncpa [#allocation4 + $0x1], 0  ;;  %s736_s18 = smov 0   ;;  %s738_s19 = smov 0  }
   0x4   :  { %s740_s20 = smov 0   ;;  %s742_s21 = smov 0  }
   0x5 LB: > { %s757_s22 = sadd.s32 4294967295, %s698_s21   ;;  %s515_s23 = sadd.s32 4294967294, %s698_s21   ;;  %s698_s21 = sphi %s742_s21, %s919_s21   ;;  %s694_s20 = sphi %s740_s20, %s918_s20   ;;  %s690_s19 = sphi %s738_s19, %s917_s19   ;;  %s686_s18 = sphi %s736_s18, %s916_s18  }
   0x6   : > { %s761_s24 = sadd.s32 1, %s698_s21   ;;  %s28_s25 = sadd.s32 1, %s694_s20 }
   0x7   : > { %s25_s26 = ssub.s32 %s698_s21, %s761_s24  ;;  %p35_p0 = scmp.ne.s32.totalorder %s694_s20, %s690_s19 }
   0x8   : > { %p26_p1 = scmp.eq.s32.totalorder %s25_s26, 0  ;;  %p36_p2 = scmp.eq.s32.totalorder %s698_s21, 0 }
   0x9   : > { %p41_p3 = scmp.ne.s32.totalorder %s690_s19, %s686_s18  ;;  %p42_p4 = scmp.eq.s32.totalorder %s757_s22, 0 }
   0xa   : > { %s773_s27 = scalar_select %p26_p1, %s694_s20, %s28_s25  }
   0xb   : > { %p775_p5 = por %p36_p2, %p35_p0  ;;  %p779_p6 = por %p42_p4, %p41_p3 }
   0xc   : > { %p149_p7 = scmp.eq.s32.totalorder %s757_s22, 1  ;;  %p155_p8 = scmp.eq.s32.totalorder %s515_s23, 1 }
   0xd   : > { %s906_s29 = scalar_select %p779_p6, 1, 0 }
   0xe   : > { %p562_p10 = scmp.lt.s32.totalorder %s698_s21, 2  ;;  %p786_p11 = por %p149_p7, %p35_p0 }
   0xf   : > { %p790_p12 = por %p155_p8, %p41_p3  ;;  %s187_s7 = sand.u32 1, %s694_s20  }
  0x10   : > { %s907_s30 = scalar_select %p786_p11, 1, 0 }
  0x11   : > { %s908_s6 = scalar_select %p790_p12, 1, 0 }
  0x12   : > { %s534_s8 = sshll.u32 %s698_s21, 7  ;;  %s518_s9 = sshll.u32 %s187_s7, 3 }
  0x13   : > { %s799_s12 = scalar_lea.hbm %s897_s0, %s534_s8  ;;  %s191_s13 = scalar_lea.vmem [#allocation2], %s518_s9 }
  0x14   : > { %s199_s14 = sshll.u32 %s191_s13, 4  ;;  %p803_p13 = pnand %p562_p10, %p775_p5  ;;  %s807_s14 = int_to_ptr.vmem [resolvable:$true] %s199_s14 }
  0x15   : > { %s188_s16 = scalar_lea.sflag [#allocation3], %s187_s7  ;;  %s606_s17 = scalar_lea.hbm %s799_s12, 128 }
  0x16   : > { %p607_p2 = scmp.ne.s32.totalorder %s799_s12, %s606_s17  ;;  %p608_p3 = pneg %p803_p13 }
  0x17   : > { %s611_s26 = scalar_lea.hbm %s897_s0, 256  ;;  %p612_p5 = scmp.lt.s32.totalorder %s799_s12, %s897_s0 }
  0x18   : > { %p609_p4 = pnand %p608_p3, %p607_p2  ;;  %p613_p8 = scmp.lt.s32.totalorder %s611_s26, %s606_s17 }
  0x1a   : > { %p610_p7 = pneg %p609_p4  ;;  %p614_p10 = por %p613_p8, %p612_p5 }
  0x1c   : > { %p615_p9 = pnand %p614_p10, %p610_p7 }
  0x1e   : > { %618 = shalt.err (!%p615_p9)
}
  0x1f   : > { %s619_s7 = scalar_lea.vmem %s807_s14, 128  ;;  %s700_s9 = smov [#allocation2]  }
  0x20   : > { %p620_p0 = scmp.ne.s32.totalorder %s807_s14, %s619_s7  ;;  %s624_s10 = sshll.u32 %s700_s9, 4  ;;  %s625_s10 = int_to_ptr.vmem [resolvable:$false] %s624_s10 }
  0x21   : > { %s626_s11 = scalar_lea.vmem %s625_s10, 256  ;;  %p627_p4 = scmp.lt.s32.totalorder %s807_s14, %s625_s10 }
  0x22   : > { %p622_p1 = pnand %p620_p0, %p608_p3  ;;  %p628_p12 = scmp.lt.s32.totalorder %s626_s11, %s619_s7 }
  0x24   : > { %p623_p2 = pneg %p622_p1  ;;  %p629_p11 = por %p628_p12, %p627_p4 }
  0x26   : > { %p630_p6 = pnand %p629_p11, %p623_p2 }
  0x28   : > { %633 = shalt.err (!%p630_p6)
}
  0x29   : > { %557 = dma.hbm_to_vmem [thread:$0]  (!%p803_p13), %s799_s12, 128, %s807_s14, %s188_s16  }
  0x2a   : > { %p910_p9 = scmp.lt.s32.totalorder %s698_s21, 3  ;;  %p911_p7 = scmp.ge.s32.totalorder %s698_s21, 1 }
  0x2c   : > { %p205_p0 = pnand %p911_p7, %p910_p9 }
  0x2d   : > { %s834_s13 = sand.u32 (!%p205_p0), 1, %s690_s19   ;;  %p912_p6 = scmp.ne.s32.totalorder (!%p205_p0), %s906_s29, 0 }
  0x2e   : > { %208 = sbr.rel (%p205_p0) target bundleno = 765 (0x2fd), region = 40  ;;  %s522_s17 = sshll.u32 (!%p205_p0), %s834_s13, 3 }
  0x2f   : > { %s211_s23 = scalar_lea.sflag (!%p205_p0), [#allocation3], %s834_s13  ;;  %s214_s15 = scalar_lea.vmem (!%p205_p0), [#allocation2], %s522_s17 }
  0x33   : > { %677 = dma.done.wait (%p912_p6), %s211_s23, 128  }
  0x34   : > { %679 = vsyncadd (%p912_p6), %s211_s23, 4294967168  ;;  %vm245_vm0 = vcmask 1043456   ;;  %v241_v0 = vld [vmem:[%s214_s15] sm:$0xff]  ;;  %v701_v5 = vmov 0.0   ;;  %vm702_vm1 = vmmov 0   ;;  %vm254_vm2 = vcmask 31744  }
  0x35   : > { %v243_v1 = vcombine.high %v241_v0, %v241_v0  ;;  %v246_v2 = vsel %vm245_vm0, %v241_v0, 0.0  ;;  %540 = vmatprep.subr.mxu0 %v701_v5  ;;  %545 = vmatprep.subr.mxu1 %v701_v5  ;;  %v252_v8 = vld [vmem:[%s898_s1] sm:$0xf]  ;;  %v703_v15 = vmov 0   ;;  %v704_v24 = vmov 839922192  }
  0x36   : > { %542 = vmatprep.mubr.msk.f32.mxu0 %vm702_vm1, %v701_v5  ;;  %547 = vmatprep.mubr.msk.f32.mxu1 %vm702_vm1, %v701_v5  ;;  %v253_v9 = vld [vmem:[%s899_s2] sm:$0xf]  ;;  %v421_v25 = vunpack.c.l.s4 %v704_v24  ;;  %v423_v26 = vlaneseq  ;;  %s535_s7 = sshll.u32 %s757_s22, 7  ;;  %s240_s9 = scalar_lea.vmem [#allocation5], %s522_s17 }
  0x37   : > { %v247_v3 = vsel %vm245_vm0, %v243_v1, 0.0  ;;  %v332_v14 = vld [vmem:[%s900_s3] sm:$0xf]  ;;  %600 = vset.pattern.permute.xlu0 %v703_v15  ;;  %s445_s10 = sshll.u32 %s240_s9, 4  ;;  %s443_s15 = scalar_lea.hbm %s902_s5, %s535_s7  ;;  %s446_s10 = int_to_ptr.vmem [resolvable:$true] %s445_s10 }
  0x38   : > { %v248_v4 = vadd.f32 %v247_v3, %v246_v2  ;;  %v333_v16 = vld [vmem:[%s901_s4] sm:$0xf]  ;;  %v422_v27 = vunpack.c.0.s8 %v421_v25  ;;  %v424_v28 = vshrl.u32 %v423_v26, 7  ;;  %s431_s12 = scalar_lea.sflag [#allocation4], %s834_s13  ;;  %s634_s29 = scalar_lea.vmem %s446_s10, 128 }
  0x39   : > { %p635_p11 = scmp.ne.s32.totalorder %s446_s10, %s634_s29  ;;  %p913_p12 = scmp.ne.s32.totalorder %s907_s30, 0 }
  0x3a   : > { %249 = vadd.xlane.f32.xlu0 %v248_v4  ;;  %v425_v29 = vsub.s32 %v422_v27, %v424_v28  ;;  %s705_s14 = smov [#allocation5]  }
  0x3b   : > { %p636_p13 = pnand %p635_p11, %p913_p12  ;;  %s638_s16 = sshll.u32 %s705_s14, 4  ;;  %s639_s16 = int_to_ptr.vmem [resolvable:$false] %s638_s16 }
  0x3c   : > { %s640_s22 = scalar_lea.vmem %s639_s16, 256  ;;  %p641_p3 = scmp.lt.s32.totalorder %s446_s10, %s639_s16 }
  0x3d   : > { %p637_p1 = pneg %p636_p13  ;;  %p642_p5 = scmp.lt.s32.totalorder %s640_s22, %s634_s29 }
  0x3f   : > { %p643_p8 = por %p642_p5, %p641_p3 }
  0x41   : > { %p644_p10 = pnand %p643_p8, %p637_p1 }
  0xc3   : > { %v250_v6 = vpop.xlane.xlu0 %249 }
  0xc4   : > { %v251_v7 = vmul.f32 0.00390625, %v250_v6 }
  0xc6   : > { %541 = vmatpush3.msk.msra.mxu0 %vm245_vm0, %v251_v7 }
  0xc7   : > { %543 = vmatmul.mubr.msk.f32.vlgmr.msra.gmra.mxu0 %vm254_vm2, %v252_v8 }
 0x187   : > { %v327_v10 = vpop.f32.mrf.mxu0 }
 0x188   : > { %v328_v11 = vadd.f32 %v327_v10, %v253_v9 }
 0x189   : > { %v544_v12 = vpop.f32.mrf.mxu0 }
 0x18a   : > { %v331_v13 = vmax.f32 %v328_v11, 0.0 }
 0x18c   : > { %546 = vmatpush3.msk.msra.mxu1 %vm245_vm0, %v331_v13 }
 0x18d   : > { %548 = vmatmul.mubr.msk.f32.vlgmr.msra.gmra.mxu1 %vm254_vm2, %v332_v14 }
 0x24d   : > { %v406_v17 = vpop.f32.mrf.mxu1 }
 0x24e   : > { %v407_v18 = vadd.f32 %v406_v17, %v333_v16 }
 0x24f   : > { %v549_v19 = vpop.f32.mrf.mxu1 }
 0x250   : > { %v528_v20 = vmul.f32 -1.442695, %v407_v18 }
 0x252   : > { %602 = vpow2.f32 %v528_v20 }
 0x25f   : > { %v603_v21 = vpop.eup %602 }
 0x260   : > { %v413_v22 = vadd.f32 1.0, %v603_v21 }
 0x262   : > { %604 = vrcp.f32 %v413_v22 }
 0x26f   : > { %v605_v23 = vpop.eup %604 }
 0x270   : > { %418 = vperm.xlu0 %600, %v605_v23  }
 0x2eb   : > { %v419_v30 = vpop.permute.xlu0 %418 }
 0x2ec   : > { %v426_v31 = vrot.slane %v419_v30, %v425_v29 }
 0x2ee   : > { %v428_v32 = vmul.f32 %v426_v31, %v241_v0 }
 0x2f0   : > { %429 = vst [vmem:[%s240_s9] sm:$0xff] %v428_v32 }
 0x2f1   : > { %647 = shalt.err (!%p644_p10)
}
 0x2f2   : > { %s648_s17 = scalar_lea.hbm %s443_s15, 128  ;;  %s652_s26 = scalar_lea.hbm %s902_s5, 256 }
 0x2f3   : > { %p649_p2 = scmp.ne.s32.totalorder %s443_s15, %s648_s17  ;;  %p653_p7 = scmp.lt.s32.totalorder %s443_s15, %s902_s5 }
 0x2f4   : > { %p654_p0 = scmp.lt.s32.totalorder %s652_s26, %s648_s17 }
 0x2f5   : > { %p650_p4 = pnand %p649_p2, %p913_p12 }
 0x2f6   : > { %p655_p6 = por %p654_p0, %p653_p7 }
 0x2f7   : > { %p651_p9 = pneg %p650_p4 }
 0x2f9   : > { %p656_p11 = pnand %p655_p6, %p651_p9 }
 0x2fb   : > { %659 = shalt.err (!%p656_p11)
}
 0x2fc   : > { %552 = dma.vmem_to_hbm [thread:$0]  (%p913_p12), %s446_s10, 128, %s443_s15, %s431_s12  }
 0x2fd PF: > { %s457_s7 = sand.u32 1, %s686_s18   ;;  %p914_p13 = scmp.ne.s32.totalorder %s908_s6, 0 }
 0x2fe   : > { %p915_p1 = scmp.ge.s32.totalorder %s698_s21, 2  ;;  %s458_s9 = scalar_lea.sflag [#allocation4], %s457_s7 }
 0x300   : > { %p559_p3 = pnand %p915_p1, %p914_p13 }
 0x302   : > { %p560_p5 = pneg %p559_p3 }
 0x304   : > { %681 = dma.done.wait (%p560_p5), %s458_s9, 128  }
 0x305   : > { %683 = vsyncadd (%p560_p5), %s458_s9, 4294967168  ;;  %p18_p8 = scmp.ge.s32.totalorder %s761_s24, 4   ;;  %s916_s18 = smov %s690_s19 }
 0x306   : > { %s917_s19 = smov %s694_s20  ;;  %s918_s20 = smov %s773_s27 }
 0x307   : > { %s919_s21 = smov %s761_s24  ;;  %20 = sbr.rel (!%p18_p8) target bundleno = 5 (0x5), region = 85 }
 0x30c   :  { %463 = vsyncpa [#allocation3], 1 }
 0x30d   :  { %465 = vsyncpa [#allocation3 + $0x1], 1 }
 0x30e   :  { %466 = vsyncpa [#allocation4], 1 }
 0x30f   :  { %468 = vsyncpa [#allocation4 + $0x1], 1 }

</bundles_post_ra>
